<compile_context>
chip_gen: v6e
topology: v6e:2x2x1
jax: 0.10.0
libtpu: 0.0.40
codegen_flags: <defaults>
</compile_context>

<pallas_src>
import functools

import jax
import jax.numpy as jnp
from jax.experimental import pallas as pl
from jax.experimental.pallas import tpu as pltpu


def _round_up(n: int, m: int) -> int:
    return ((n + m - 1) // m) * m


def _choose_batch_tile(B: int, block_batch: int, align: int) -> int:
    """Waste-aware batch tile: aligned, big, and >=2 tiles for large batches."""
    b_al = _round_up(B, align)
    cap = max(align, (block_batch // align) * align)   # guard user-supplied sizes
    if cap >= b_al:
        # Whole batch fits in one tile.
        if b_al >= 1024:
            # Split into two tiles so the "parallel" batch axis can be
            # sharded across both TensorCores on v7x megacore.
            return _round_up((b_al + 1) // 2, align)
        return b_al
    # Shrink the tile (cap, then multiples of 256) until last-tile waste <=10%.
    candidates = [cap] + list(range((cap // 256) * 256, 255, -256))
    best_t, best_waste = cap, None
    for t in candidates:
        t = max(align, (t // align) * align)
        waste = _round_up(b_al, t) - b_al
        if waste <= 0.10 * b_al:
            return t
        if best_waste is None or waste < best_waste:
            best_t, best_waste = t, waste
    return best_t


def _basic_nn_kernel(x_ref, w1_ref, b1_ref, w2_ref, b2_ref, w3_ref, b3_ref,
                     o_ref, *, classification: bool):
    # x streams as f32; cast to the weight dtype only at the MXU input.
    # Matmuls accumulate in f32; bias / ReLU / softmax stay f32 (v5e-safe).
    h1 = jnp.dot(x_ref[...].astype(w1_ref.dtype), w1_ref[...],
                 preferred_element_type=jnp.float32)
    h1 = jnp.maximum(h1 + b1_ref[...], 0.0)

    h2 = jnp.dot(h1.astype(w2_ref.dtype), w2_ref[...],
                 preferred_element_type=jnp.float32)
    h2 = jnp.maximum(h2 + b2_ref[...], 0.0)

    # Layer 3: logits.  Output lane axis is pre-padded to 128; pad columns
    # carry bias -1e30 (classification) so they vanish from the normalizer.
    logits = jnp.dot(h2.astype(w3_ref.dtype), w3_ref[...],
                     preferred_element_type=jnp.float32) + b3_ref[...]

    if classification:
        m = jnp.max(logits, axis=-1, keepdims=True)
        z = logits - m
        lse = jnp.log(jnp.sum(jnp.exp(z), axis=-1, keepdims=True))
        o_ref[...] = (z - lse).astype(o_ref.dtype)
    else:
        o_ref[...] = logits.astype(o_ref.dtype)


class BasicNNPallas:
    """Pallas-TPU forward pass of BasicNN.  Weight prep is done once here."""

    def __init__(self, params, pred_type="classification", *,
                 weight_dtype=jnp.bfloat16,
                 block_batch: int = 2048,
                 out_dtype=jnp.float32):
        self.pred_type = pred_type
        self.classification = (pred_type == "classification")
        self.block_batch = int(block_batch)
        self.out_dtype = jnp.dtype(out_dtype)

        w1, b1, w2, b2, w3, b3 = (params[k] for k in
                                  ("w1", "b1", "w2", "b2", "w3", "b3"))
        self.in_size = int(w1.shape[0])
        self.hidden = int(w1.shape[1])
        self.out_size = int(w3.shape[1])
        # Lane-dense output: pad class axis up to a multiple of 128 lanes.
        self.out_pad = _round_up(max(self.out_size, 128), 128)

        pad_bias = -1e30 if self.classification else 0.0
        w3p = jnp.zeros((self.hidden, self.out_pad), w3.dtype)
        w3p = w3p.at[:, :self.out_size].set(w3)
        b3p = jnp.full((1, self.out_pad), pad_bias, jnp.float32)
        b3p = b3p.at[:, :self.out_size].set(b3.astype(jnp.float32).reshape(1, -1))

        # Hoisted per-call work: cast weights to bf16 / pad w3 exactly once.
        self.w1 = w1.astype(weight_dtype)
        self.w2 = w2.astype(weight_dtype)
        self.w3 = w3p.astype(weight_dtype)
        self.b1 = b1.astype(jnp.float32).reshape(1, -1)
        self.b2 = b2.astype(jnp.float32).reshape(1, -1)
        self.b3 = b3p

    def __call__(self, x, *, padded_output: bool = False):
        """x: [B, input_size] -> [B, output_size] (log-probs if classification).

        padded_output=True returns the lane-padded [B, 128*k] array directly
        (skips the minor-dim slice; pad columns hold ~-1e30 / 0 and must be
        ignored by the consumer).
        """
        B, in_size = x.shape
        assert in_size == self.in_size, "input feature size mismatch"
        x = x.astype(jnp.float32)

        H, out_pad = self.hidden, self.out_pad
        out_itemsize = self.out_dtype.itemsize
        align = 8 if out_itemsize >= 4 else 16   # bf16 output -> sublane 16
        tb = _choose_batch_tile(B, self.block_batch, align)
        grid = (pl.cdiv(B, tb),)

        w_itemsize = jnp.dtype(self.w1.dtype).itemsize
        weight_elems = in_size * H + H * H + H * out_pad

        # VMEM: double-buffered x / out tiles + resident weights + f32 temps.
        vmem_need = (2 * tb * in_size * 4
                     + 2 * tb * out_pad * out_itemsize
                     + 2 * weight_elems * w_itemsize
                     + 2 * (2 * H + out_pad) * 4
                     + tb * (2 * H + out_pad) * 4)
        vmem_limit = min(max(32 << 20, int(vmem_need * 3 // 2)), 48 << 20)

        cost = pl.CostEstimate(
            flops=2 * B * weight_elems,
            transcendentals=(B * out_pad) if self.classification else 0,
            bytes_accessed=(B * in_size * 4                 # x in (f32)
                            + weight_elems * w_itemsize     # weights
                            + (2 * H + out_pad) * 4         # biases
                            + B * out_pad * out_itemsize))  # out

        kernel = functools.partial(_basic_nn_kernel,
                                   classification=self.classification)

        out = pl.pallas_call(
            kernel,
            out_shape=jax.ShapeDtypeStruct((B, out_pad), self.out_dtype),
            grid=grid,
            in_specs=[
                # x: streamed per batch tile (double-buffered by the pipeline;
                # partial last tile handled by Pallas boundary masking).
                pl.BlockSpec((tb, in_size), lambda i: (i, 0)),
                # Weights / biases: constant block index -> VMEM-resident.
                pl.BlockSpec((in_size, H), lambda i: (0, 0)),
                pl.BlockSpec((1, H), lambda i: (0, 0)),
                pl.BlockSpec((H, H), lambda i: (0, 0)),
                pl.BlockSpec((1, H), lambda i: (0, 0)),
                pl.BlockSpec((H, out_pad), lambda i: (0, 0)),
                pl.BlockSpec((1, out_pad), lambda i: (0, 0)),
            ],
            out_specs=pl.BlockSpec((tb, out_pad), lambda i: (i, 0)),
            compiler_params=pltpu.CompilerParams(
                dimension_semantics=("parallel",),   # batch across v7x TCs
                vmem_limit_bytes=vmem_limit),
            cost_estimate=cost,
        )(x, self.w1, self.b1, self.w2, self.b2, self.w3, self.b3)

        if padded_output:
            return out
        return out[:, :self.out_size]


def init_params(key, input_size, output_size, hidden_size=64):
    """Deterministic PyTorch-style init: U(-1/sqrt(fan_in), 1/sqrt(fan_in))."""
    ks = jax.random.split(key, 6)

    def lin(kw, kb, fan_in, fan_out):
        bound = 1.0 / jnp.sqrt(jnp.float32(fan_in))
        w = jax.random.uniform(kw, (fan_in, fan_out), jnp.float32, -bound, bound)
        b = jax.random.uniform(kb, (1, fan_out), jnp.float32, -bound, bound)
        return w, b

    w1, b1 = lin(ks[0], ks[1], input_size, hidden_size)
    w2, b2 = lin(ks[2], ks[3], hidden_size, hidden_size)
    w3, b3 = lin(ks[4], ks[5], hidden_size, output_size)
    return dict(w1=w1, b1=b1, w2=w2, b2=b2, w3=w3, b3=b3)


def _reference_forward(x, params, pred_type="classification",
                       weight_dtype=jnp.bfloat16):
    """Pure-JAX reference mirroring the kernel's mixed precision."""
    cd = weight_dtype
    h = jnp.dot(x.astype(cd), params["w1"].astype(cd),
                preferred_element_type=jnp.float32) + params["b1"]
    h = jnp.maximum(h, 0.0)
    h = jnp.dot(h.astype(cd), params["w2"].astype(cd),
                preferred_element_type=jnp.float32) + params["b2"]
    h = jnp.maximum(h, 0.0)
    logits = jnp.dot(h.astype(cd), params["w3"].astype(cd),
                     preferred_element_type=jnp.float32) + params["b3"]
    if pred_type == "classification":
        return jax.nn.log_softmax(logits, axis=1)
    return logits


# TODO(synk): fit()/test() (Adam + CrossEntropy/MSE training loops) are host-side
# training utilities, not part of the forward pass, and are not translated.

if __name__ == "__main__":
    key = jax.random.PRNGKey(0)
    k_param, k_x, k_x2 = jax.random.split(key, 3)

    batch = 8
    input_size = 16
    hidden_size = 64
    output_size = 10

    params = init_params(k_param, input_size, output_size, hidden_size)
    x = jax.random.normal(k_x, (batch, input_size), jnp.float32)

    # Classification head (log_softmax).
    model = BasicNNPallas(params, pred_type="classification")
    out = jax.block_until_ready(model(x))
    ref = _reference_forward(x, params, "classification")
    assert out.shape == (batch, output_size)
    assert jnp.allclose(out, ref, atol=2e-3, rtol=2e-3), "classification mismatch"

    # Regression head (raw logits).
    model_reg = BasicNNPallas(params, pred_type="regression")
    out_reg = jax.block_until_ready(model_reg(x))
    ref_reg = _reference_forward(x, params, "regression")
    assert jnp.allclose(out_reg, ref_reg, atol=2e-3, rtol=2e-3), "regression mismatch"

    # Awkward (non multiple-of-8) batch exercises the partial last tile path.
    x2 = jax.random.normal(k_x2, (37, input_size), jnp.float32)
    out2 = jax.block_until_ready(model(x2))
    ref2 = _reference_forward(x2, params, "classification")
    assert out2.shape == (37, output_size)
    assert jnp.allclose(out2, ref2, atol=2e-3, rtol=2e-3), "partial-tile mismatch"

    print("KERNEL_OK")
</pallas_src>

<mosaic_0001>
module attributes {stable_mosaic.version = 11 : i64} {
  func.func @_basic_nn_kernel(%arg0: i32, %arg1: memref<8x16xf32, #tpu.memory_space<vmem>>, %arg2: memref<16x64xbf16, #tpu.memory_space<vmem>>, %arg3: memref<1x64xf32, #tpu.memory_space<vmem>>, %arg4: memref<64x64xbf16, #tpu.memory_space<vmem>>, %arg5: memref<1x64xf32, #tpu.memory_space<vmem>>, %arg6: memref<64x128xbf16, #tpu.memory_space<vmem>>, %arg7: memref<1x128xf32, #tpu.memory_space<vmem>>, %arg8: memref<8x128xf32, #tpu.memory_space<vmem>>) attributes {dimension_semantics = [#tpu.dimension_semantics<parallel>], iteration_bounds = array<i64: 1>, scalar_prefetch = 0 : i64, scratch_operands = 0 : i64, tpu.core_type = #tpu.core_type<tc>, window_params = [{transform_indices = @transform_0, window_bounds = array<i64: 8, 16>}, {pipeline_mode = #tpu.pipeline_mode<synchronous>, transform_indices = @transform_1, window_bounds = array<i64: 16, 64>}, {pipeline_mode = #tpu.pipeline_mode<synchronous>, transform_indices = @transform_2, window_bounds = array<i64: 1, 64>}, {pipeline_mode = #tpu.pipeline_mode<synchronous>, transform_indices = @transform_3, window_bounds = array<i64: 64, 64>}, {pipeline_mode = #tpu.pipeline_mode<synchronous>, transform_indices = @transform_4, window_bounds = array<i64: 1, 64>}, {pipeline_mode = #tpu.pipeline_mode<synchronous>, transform_indices = @transform_5, window_bounds = array<i64: 64, 128>}, {pipeline_mode = #tpu.pipeline_mode<synchronous>, transform_indices = @transform_6, window_bounds = array<i64: 1, 128>}, {transform_indices = @transform_7, window_bounds = array<i64: 8, 128>}]} {
    %c0 = arith.constant 0 : index
    %c0_0 = arith.constant 0 : index
    %0 = vector.load %arg1[%c0, %c0_0] : memref<8x16xf32, #tpu.memory_space<vmem>>, vector<8x16xf32>
    %1 = arith.truncf %0 : vector<8x16xf32> to vector<8x16xbf16>
    %c0_1 = arith.constant 0 : index
    %c0_2 = arith.constant 0 : index
    %2 = vector.load %arg2[%c0_1, %c0_2] : memref<16x64xbf16, #tpu.memory_space<vmem>>, vector<16x64xbf16>
    %cst = arith.constant dense<0.000000e+00> : vector<8x64xf32>
    %3 = tpu.matmul %1, %2, %cst {dimension_numbers = #tpu.dot_dimension_numbers<[1], [0], [0], [1], [0, 0, 1, 1], [], []>} : vector<8x16xbf16>, vector<16x64xbf16>, vector<8x64xf32> -> vector<8x64xf32>
    %c0_3 = arith.constant 0 : index
    %c0_4 = arith.constant 0 : index
    %4 = vector.load %arg3[%c0_3, %c0_4] : memref<1x64xf32, #tpu.memory_space<vmem>>, vector<1x64xf32>
    %5 = vector.broadcast %4 : vector<1x64xf32> to vector<8x64xf32>
    %6 = arith.addf %3, %5 : vector<8x64xf32>
    %cst_5 = arith.constant 0.000000e+00 : f32
    %7 = vector.broadcast %cst_5 : f32 to vector<8x64xf32>
    %8 = arith.maximumf %6, %7 : vector<8x64xf32>
    %9 = arith.truncf %8 : vector<8x64xf32> to vector<8x64xbf16>
    %c0_6 = arith.constant 0 : index
    %c0_7 = arith.constant 0 : index
    %10 = vector.load %arg4[%c0_6, %c0_7] : memref<64x64xbf16, #tpu.memory_space<vmem>>, vector<64x64xbf16>
    %cst_8 = arith.constant dense<0.000000e+00> : vector<8x64xf32>
    %11 = tpu.matmul %9, %10, %cst_8 {dimension_numbers = #tpu.dot_dimension_numbers<[1], [0], [0], [1], [0, 0, 1, 1], [], []>} : vector<8x64xbf16>, vector<64x64xbf16>, vector<8x64xf32> -> vector<8x64xf32>
    %c0_9 = arith.constant 0 : index
    %c0_10 = arith.constant 0 : index
    %12 = vector.load %arg5[%c0_9, %c0_10] : memref<1x64xf32, #tpu.memory_space<vmem>>, vector<1x64xf32>
    %13 = vector.broadcast %12 : vector<1x64xf32> to vector<8x64xf32>
    %14 = arith.addf %11, %13 : vector<8x64xf32>
    %cst_11 = arith.constant 0.000000e+00 : f32
    %15 = vector.broadcast %cst_11 : f32 to vector<8x64xf32>
    %16 = arith.maximumf %14, %15 : vector<8x64xf32>
    %17 = arith.truncf %16 : vector<8x64xf32> to vector<8x64xbf16>
    %c0_12 = arith.constant 0 : index
    %c0_13 = arith.constant 0 : index
    %18 = vector.load %arg6[%c0_12, %c0_13] : memref<64x128xbf16, #tpu.memory_space<vmem>>, vector<64x128xbf16>
    %cst_14 = arith.constant dense<0.000000e+00> : vector<8x128xf32>
    %19 = tpu.matmul %17, %18, %cst_14 {dimension_numbers = #tpu.dot_dimension_numbers<[1], [0], [0], [1], [0, 0, 1, 1], [], []>} : vector<8x64xbf16>, vector<64x128xbf16>, vector<8x128xf32> -> vector<8x128xf32>
    %c0_15 = arith.constant 0 : index
    %c0_16 = arith.constant 0 : index
    %20 = vector.load %arg7[%c0_15, %c0_16] : memref<1x128xf32, #tpu.memory_space<vmem>>, vector<1x128xf32>
    %21 = vector.broadcast %20 : vector<1x128xf32> to vector<8x128xf32>
    %22 = arith.addf %19, %21 : vector<8x128xf32>
    %cst_17 = arith.constant dense<0xFF800000> : vector<8xf32>
    %23 = vector.multi_reduction <maximumf>, %22, %cst_17 [1] : vector<8x128xf32> to vector<8xf32>
    %24 = vector.shape_cast %23 : vector<8xf32> to vector<8x1xf32>
    %25 = vector.broadcast %24 : vector<8x1xf32> to vector<8x128xf32>
    %26 = arith.subf %22, %25 : vector<8x128xf32>
    %27 = math.exp %26 : vector<8x128xf32>
    %cst_18 = arith.constant dense<0.000000e+00> : vector<8xf32>
    %28 = vector.multi_reduction <add>, %27, %cst_18 [1] : vector<8x128xf32> to vector<8xf32>
    %29 = vector.shape_cast %28 : vector<8xf32> to vector<8x1xf32>
    %30 = math.log %29 : vector<8x1xf32>
    %31 = vector.broadcast %30 : vector<8x1xf32> to vector<8x128xf32>
    %32 = arith.subf %26, %31 : vector<8x128xf32>
    %c0_19 = arith.constant 0 : index
    %c0_20 = arith.constant 0 : index
    %33 = vector.load %arg8[%c0_19, %c0_20] : memref<8x128xf32, #tpu.memory_space<vmem>>, vector<8x128xf32>
    tpu.vector_store %arg8[%c0_19, %c0_20], %32 {strides = array<i32>} : memref<8x128xf32, #tpu.memory_space<vmem>>, vector<8x128xf32>,
    return
  }
  func.func @transform_0(%arg0: i32) -> (i32, i32) {
    %c0_i32 = arith.constant 0 : i32
    %c0_i32_0 = arith.constant 0 : i32
    return %arg0, %c0_i32 : i32, i32
  }
  func.func @transform_1(%arg0: i32) -> (i32, i32) {
    %c0_i32 = arith.constant 0 : i32
    %c0_i32_0 = arith.constant 0 : i32
    %c0_i32_1 = arith.constant 0 : i32
    return %c0_i32, %c0_i32_0 : i32, i32
  }
  func.func @transform_2(%arg0: i32) -> (i32, i32) {
    %c0_i32 = arith.constant 0 : i32
    %c0_i32_0 = arith.constant 0 : i32
    %c0_i32_1 = arith.constant 0 : i32
    return %c0_i32, %c0_i32_0 : i32, i32
  }
  func.func @transform_3(%arg0: i32) -> (i32, i32) {
    %c0_i32 = arith.constant 0 : i32
    %c0_i32_0 = arith.constant 0 : i32
    %c0_i32_1 = arith.constant 0 : i32
    return %c0_i32, %c0_i32_0 : i32, i32
  }
  func.func @transform_4(%arg0: i32) -> (i32, i32) {
    %c0_i32 = arith.constant 0 : i32
    %c0_i32_0 = arith.constant 0 : i32
    %c0_i32_1 = arith.constant 0 : i32
    return %c0_i32, %c0_i32_0 : i32, i32
  }
  func.func @transform_5(%arg0: i32) -> (i32, i32) {
    %c0_i32 = arith.constant 0 : i32
    %c0_i32_0 = arith.constant 0 : i32
    %c0_i32_1 = arith.constant 0 : i32
    return %c0_i32, %c0_i32_0 : i32, i32
  }
  func.func @transform_6(%arg0: i32) -> (i32, i32) {
    %c0_i32 = arith.constant 0 : i32
    %c0_i32_0 = arith.constant 0 : i32
    %c0_i32_1 = arith.constant 0 : i32
    return %c0_i32, %c0_i32_0 : i32, i32
  }
  func.func @transform_7(%arg0: i32) -> (i32, i32) {
    %c0_i32 = arith.constant 0 : i32
    %c0_i32_0 = arith.constant 0 : i32
    return %arg0, %c0_i32 : i32, i32
  }
}

</mosaic_0001>

<bundles_post_ra>
// kernel: tpu_custom_call.1
= control target key start
LH: loop header
LB: loop body
LE: loop exit
PB: predicated region body
PF: predicated region fallthrough
CT: control target
= control target key end

     0   :  { %12 = vsyncpa [#allocation3], 0  ;;  %s610_s0 = inlined_call_operand.hbm [shape: f32[8,16], index: 0, kind: input, shape index: {}]   ;;  %s611_s1 = inlined_call_operand.hbm [shape: bf16[16,64], index: 1, kind: input, shape index: {}]   ;;  %s612_s2 = inlined_call_operand.vmem [shape: f32[1,64], index: 2, kind: input, shape index: {}]   ;;  %s613_s3 = inlined_call_operand.hbm [shape: bf16[64,64], index: 3, kind: input, shape index: {}]   ;;  %s614_s4 = inlined_call_operand.vmem [shape: f32[1,64], index: 4, kind: input, shape index: {}]   ;;  %s615_s5 = inlined_call_operand.hbm [shape: bf16[64,128], index: 5, kind: input, shape index: {}]   ;;  %s616_s6 = inlined_call_operand.vmem [shape: f32[1,128], index: 6, kind: input, shape index: {}]   ;;  %s617_s7 = inlined_call_operand.hbm [shape: f32[8,128], index: 7, kind: output, shape index: {}]  }
   0x1   :  { %13 = vsyncpa [#allocation6], 0 }
   0x2   :  { %14 = vsyncpa [#allocation9], 0 }
   0x3   :  { %15 = vsyncpa [#allocation4], 0  ;;  %s526_s24 = smov [#allocation5]  }
   0x4   :  { %s31_s25 = sshll.u32 %s526_s24, 4  ;;  %s32_s25 = int_to_ptr.vmem [resolvable:$true] %s31_s25 }
   0x5   :  { %s426_s26 = scalar_lea.vmem %s32_s25, 128  ;;  %p431_p1 = scmp.lt.s32.totalorder %s32_s25, %s32_s25 }
   0x6   :  { %p427_p0 = scmp.ne.s32.totalorder %s32_s25, %s426_s26  ;;  %p432_p2 = scmp.lt.s32.totalorder %s426_s26, %s426_s26 }
   0x8   :  { %p433_p3 = por %p432_p2, %p431_p1 }
   0xa   :  { %p434_p4 = pnand %p433_p3, %p427_p0 }
   0xc   :  { %437 = shalt.err (!%p434_p4)
}
   0xd   :  { %s527_s27 = smov 64   ;;  %s528_s28 = smov 4  }
   0xe   :  { %37 = dma.hbm_to_vmem [thread:$0]  %s611_s1, 128, %s32_s25, [#allocation6], %s527_s27, %s527_s27, %s528_s28  }
   0xf   :  { %s529_s8 = smov [#allocation2]   ;;  %s530_s10 = smov [#allocation7]  }
  0x10   :  { %s22_s9 = sshll.u32 %s529_s8, 4  ;;  %s45_s11 = sshll.u32 %s530_s10, 4  ;;  %s23_s9 = int_to_ptr.vmem [resolvable:$true] %s22_s9  ;;  %s46_s11 = int_to_ptr.vmem [resolvable:$true] %s45_s11 }
  0x11   :  { %s446_s12 = scalar_lea.vmem %s23_s9, 128  ;;  %p451_p6 = scmp.lt.s32.totalorder %s23_s9, %s23_s9 }
  0x12   :  { %p447_p5 = scmp.ne.s32.totalorder %s23_s9, %s446_s12  ;;  %p452_p7 = scmp.lt.s32.totalorder %s446_s12, %s446_s12 }
  0x14   :  { %p453_p8 = por %p452_p7, %p451_p6 }
  0x16   :  { %p454_p9 = pnand %p453_p8, %p447_p5 }
  0x18   :  { %457 = shalt.err (!%p454_p9)
}
  0x19   :  { %25 = dma.hbm_to_vmem [thread:$0]  %s610_s0, 128, %s23_s9, [#allocation3]  }
  0x1a   :  { %s466_s15 = scalar_lea.vmem %s46_s11, 512  ;;  %p471_p11 = scmp.lt.s32.totalorder %s46_s11, %s46_s11 }
  0x1b   :  { %p467_p10 = scmp.ne.s32.totalorder %s46_s11, %s466_s15  ;;  %p472_p12 = scmp.lt.s32.totalorder %s466_s15, %s466_s15 }
  0x1d   :  { %p473_p13 = por %p472_p12, %p471_p11 }
  0x1f   :  { %p474_p0 = pnand %p473_p13, %p467_p10 }
  0x21   :  { %477 = shalt.err (!%p474_p0)
}
  0x22   :  { %51 = dma.hbm_to_vmem [thread:$0]  %s613_s3, 512, %s46_s11, [#allocation6], %s527_s27, %s527_s27, %s528_s28  }
  0x23   :  { %s531_s17 = smov [#allocation8]  }
  0x24   :  { %s59_s18 = sshll.u32 %s531_s17, 4  ;;  %s60_s18 = int_to_ptr.vmem [resolvable:$true] %s59_s18 }
  0x25   :  { %s486_s19 = scalar_lea.vmem %s60_s18, 512  ;;  %p491_p2 = scmp.lt.s32.totalorder %s60_s18, %s60_s18 }
  0x26   :  { %p487_p1 = scmp.ne.s32.totalorder %s60_s18, %s486_s19  ;;  %p492_p3 = scmp.lt.s32.totalorder %s486_s19, %s486_s19 }
  0x28   :  { %p493_p4 = por %p492_p3, %p491_p2 }
  0x2a   :  { %p494_p5 = pnand %p493_p4, %p487_p1 }
  0x2c   :  { %497 = shalt.err (!%p494_p5)
}
  0x2d   :  { %65 = dma.hbm_to_vmem [thread:$0]  %s615_s5, 512, %s60_s18, [#allocation9], %s527_s27, %s527_s27, %s528_s28  }
  0x2e   :  { %518 = dma.done.wait [#allocation3], 128  }
  0x2f   :  { %519 = vsyncadd [#allocation3], 4294967168 }
  0x30   :  { %520 = dma.done.wait [#allocation6], 640  }
  0x31   :  { %521 = vsyncadd [#allocation6], 4294966656 }
  0x32   :  { %522 = dma.done.wait [#allocation9], 512  }
  0x33   :  { %523 = vsyncadd [#allocation9], 4294966784  ;;  %v532_v0 = vmov 0.0   ;;  %vm533_vm0 = vmmov 0   ;;  %v405_v1 = vld [vmem:[#allocation5] sm:$0xff]   ;;  %v81_v2 = vld [vmem:[#allocation2] sm:$0xff] }
  0x34   :  { %366 = vmatprep.subr.bf16.mxu0 %v532_v0  ;;  %368 = vmatprep.mubr.msk.bf16.mxu0 %vm533_vm0, %v532_v0  ;;  %v82_v3 = vpack.c.bf16 %v81_v2, %v81_v2  ;;  %vm98_vm1 = vcmask 130048   ;;  %v406_v4 = vld [vmem:[#allocation7 + $0x18] sm:$0xff]   ;;  %v407_v5 = vld [vmem:[#allocation7 + $0x10] sm:$0xff]   ;;  %v408_v6 = vld [vmem:[#allocation7 + $0x8] sm:$0xff]   ;;  %vm183_vm2 = vcmask 523264  }
  0x35   :  { %372 = vmatprep.subr.bf16.mxu1 %v532_v0  ;;  %380 = vmatprep.mubr.msk.bf16.mxu1 %vm533_vm0, %v532_v0  ;;  %v409_v7 = vld [vmem:[#allocation7] sm:$0xff]   ;;  %v410_v8 = vld [vmem:[#allocation8 + $0x18] sm:$0xff]   ;;  %v411_v9 = vld [vmem:[#allocation8 + $0x10] sm:$0xff]  }
  0x36   :  { %367 = vmatpush3.bf16.msra.mxu0 %v405_v1  ;;  %373 = vmatpush3.bf16.msra.mxu1 %v406_v4  ;;  %v339_v10 = vld [vmem:[%s612_s2] ss:$0 sm:$0xff]  ;;  %v412_v18 = vld [vmem:[#allocation8 + $0x8] sm:$0xff]   ;;  %v413_v19 = vld [vmem:[#allocation8] sm:$0xff]  }
  0x37   :  { %384 = vmatprep.subr.bf16.mxu0 %v532_v0  ;;  %374 = vmatprep.subr.bf16.mxu1 %v532_v0  ;;  %v342_v20 = vld [vmem:[%s614_s4] ss:$0 sm:$0xff]  ;;  %s534_s4 = smov [#allocation10]  }
  0x38   :  { %v348_v28 = vld [vmem:[%s616_s6] ss:$0 sm:$0xff]  ;;  %s328_s24 = sshll.u32 %s534_s4, 4  ;;  %s329_s24 = int_to_ptr.vmem [resolvable:$true] %s328_s24 }
  0x39   :  { %369 = vmatmul.mubr.msk.bf16.vlgmr.msra.gmra.mxu0 %vm98_vm1, %v82_v3  ;;  %s498_s6 = scalar_lea.vmem %s329_s24, 128  ;;  %p503_p7 = scmp.lt.s32.totalorder %s329_s24, %s329_s24 }
  0x3a   :  { %392 = vmatprep.mubr.msk.bf16.mxu0 %vm533_vm0, %v532_v0  ;;  %375 = vmatpush3.bf16.msra.mxu1 %v407_v5  ;;  %p499_p6 = scmp.ne.s32.totalorder %s329_s24, %s498_s6  ;;  %p504_p8 = scmp.lt.s32.totalorder %s498_s6, %s498_s6 }
  0x3b   :  { %376 = vmatprep.subr.bf16.mxu1 %v532_v0  ;;  %385 = vmatpush3.bf16.msra.mxu0 %v410_v8 }
  0x3c   :  { %386 = vmatprep.subr.bf16.mxu0 %v532_v0  ;;  %p505_p9 = por %p504_p8, %p503_p7 }
  0x3e   :  { %377 = vmatpush3.bf16.msra.mxu1 %v408_v6  ;;  %p506_p10 = pnand %p505_p9, %p499_p6 }
  0x3f   :  { %378 = vmatprep.subr.bf16.mxu1 %v532_v0  ;;  %387 = vmatpush3.bf16.msra.mxu0 %v411_v9 }
  0x40   :  { %388 = vmatprep.subr.bf16.mxu0 %v532_v0 }
  0x42   :  { %379 = vmatpush3.bf16.msra.mxu1 %v409_v7 }
  0x43   :  { %389 = vmatpush3.bf16.msra.mxu0 %v412_v18 }
  0x44   :  { %390 = vmatprep.subr.bf16.mxu0 %v532_v0 }
  0x47   :  { %391 = vmatpush3.bf16.msra.mxu0 %v413_v19 }
  0xf9   :  { %v136_v11 = vpop.f32.mrf.mxu0 }
  0xfa   :  { %v137_v12 = vadd.f32 %v339_v10, %v136_v11 }
  0xfb   :  { %v370_v13 = vpop.f32.mrf.mxu0 }
  0xfc   :  { %v142_v14 = vmax.f32 %v137_v12, 0.0 }
  0xfd   :  { %v139_v15 = vpop.f32.mrf.mxu0 }
  0xfe   :  { %v143_v16 = vpack.c.bf16 %v142_v14, %v142_v14 }
  0xff   :  { %v371_v17 = vpop.f32.mrf.mxu0 }
 0x100   :  { %381 = vmatmul.mubr.msk.bf16.vlgmr.msra.gmra.mxu1 %vm183_vm2, %v143_v16 }
 0x1c0   :  { %v221_v21 = vpop.f32.mrf.mxu1 }
 0x1c1   :  { %v222_v22 = vadd.f32 %v342_v20, %v221_v21 }
 0x1c2   :  { %v382_v23 = vpop.f32.mrf.mxu1 }
 0x1c3   :  { %v227_v24 = vmax.f32 %v222_v22, 0.0 }
 0x1c4   :  { %v224_v25 = vpop.f32.mrf.mxu1 }
 0x1c5   :  { %v228_v26 = vpack.c.bf16 %v227_v24, %v227_v24 }
 0x1c6   :  { %v383_v27 = vpop.f32.mrf.mxu1 }
 0x1c7   :  { %393 = vmatmul.mubr.msk.bf16.vlgmr.msra.gmra.mxu0 %vm183_vm2, %v228_v26 }
 0x287   :  { %v305_v29 = vpop.f32.mrf.mxu0 }
 0x288   :  { %v306_v30 = vadd.f32 %v348_v28, %v305_v29 }
 0x289   :  { %v394_v31 = vpop.f32.mrf.mxu0 }
 0x28a   :  { %311 = vmax.xlane.f32.xlu0 %v306_v30 }
 0x28b   :  { %v308_v32 = vpop.f32.mrf.mxu0 }
 0x28d   :  { %v395_v33 = vpop.f32.mrf.mxu0 }
 0x313   :  { %v312_v34 = vpop.xlane.xlu0 %311 }
 0x314   :  { %v313_v35 = vsub.f32 %v306_v30, %v312_v34 }
 0x316   :  { %v314_v36 = vmul.f32 1.442695, %v313_v35 }
 0x318   :  { %414 = vpow2.f32 %v314_v36 }
 0x325   :  { %v415_v37 = vpop.eup %414 }
 0x326   :  { %316 = vadd.xlane.f32.xlu0 %v415_v37 }
 0x3af   :  { %v317_v38 = vpop.xlane.xlu0 %316 }
 0x3b0   :  { %416 = vlog2.f32 %v317_v38 }
 0x3bd   :  { %v417_v39 = vpop.eup %416 }
 0x3be   :  { %v319_v40 = vmul.f32 0.6931472, %v417_v39 }
 0x3c0   :  { %v320_v41 = vsub.f32 %v313_v35, %v319_v40 }
 0x3c2   :  { %321 = vst [vmem:[#allocation10] sm:$0xff] %v320_v41 }
 0x3c3   :  { %509 = shalt.err (!%p506_p10)
}
 0x3c4   :  { %331 = dma.vmem_to_hbm [thread:$0]  %s329_s24, 128, %s617_s7, [#allocation4]  }
 0x3c5   :  { %524 = dma.done.wait [#allocation4], 128  }
 0x3c6   :  { %525 = vsyncadd [#allocation4], 4294967168 }
 0x3c7   :  { %335 = vsyncpa [#allocation3], 1 }
 0x3c8   :  { %336 = vsyncpa [#allocation6], 1 }
 0x3c9   :  { %337 = vsyncpa [#allocation9], 1 }
 0x3ca   :  { %338 = vsyncpa [#allocation4], 1 }

</bundles_post_ra>
